<compile_context>
chip_gen: v5e
topology: v5e:2x2
jax: 0.10.0
libtpu: 0.0.40
codegen_flags: <defaults>
</compile_context>

<pallas_src>
import functools

import jax
import jax.numpy as jnp
from jax.experimental import pallas as pl
from jax.experimental.pallas import tpu as pltpu

_LANES = 128


def _vmem_budgets():
    """(input-tile budget, vmem_limit_bytes), derived per TPU generation."""
    try:
        cap = pltpu.get_tpu_info().vmem_capacity_bytes
    except Exception:  # no TPU info available -> be conservative (v7x-safe)
        cap = 64 * 1024 * 1024
    if cap >= 100 * 1024 * 1024:
        # v5e / v6e: 128 MiB physical VMEM -> bigger tiles, fewer grid steps.
        return 48 * 1024 * 1024, 96 * 1024 * 1024
    # v7x: 64 MiB physical per TensorCore -> keep headroom for double-buffered
    # inputs, elementwise intermediates, (tiny) outputs and compiler scratch.
    return 24 * 1024 * 1024, 48 * 1024 * 1024


def _pick_row_tile(n_rows):
    """Multiple-of-8 row block dividing n_rows; prefers >= 2 row blocks."""
    if n_rows % 8 != 0:
        return n_rows          # full row extent (full-dim exemption)
    if n_rows == 8:
        return 8
    target = min(512, max(8, n_rows // 2))   # >= 2 blocks when possible
    tr = (target // 8) * 8
    while tr >= 8:
        if n_rows % tr == 0:
            return tr
        tr -= 8
    return n_rows


def _pick_col_tile(tile_r, L, bytes_x, bytes_y, budget):
    """Largest multiple-of-128 column tile that fits the input-tile budget."""
    l_pad = pl.cdiv(L, _LANES) * _LANES
    # Double-buffered x/y input tiles plus a small allowance for f32
    # element-wise intermediates; accumulators/outputs are (tile_r, 1|2) and
    # negligible after the accumulator-shrinking change.
    per_col = tile_r * (2 * (bytes_x + bytes_y) + 2 * 4)
    max_cols = (budget // per_col) // _LANES * _LANES
    return int(min(l_pad, max(_LANES, max_cols)))


def _dice_sums_kernel(x_ref, y_ref, out_ref, acc_xy, acc_s, *, rem, ragged):
    """Per row-block: accumulate sum(x*y) and sum(x+y) over column tiles."""
    p = pl.program_id(0)           # column-split axis (parallel)
    j = pl.program_id(2)           # reduction axis (arbitrary, innermost)
    n_p = pl.num_programs(0)
    n_j = pl.num_programs(2)

    @pl.when(j == 0)
    def _init():
        acc_xy[...] = jnp.zeros_like(acc_xy)
        acc_s[...] = jnp.zeros_like(acc_s)

    def _accumulate(masked):
        x = x_ref[...].astype(jnp.float32)
        y = y_ref[...].astype(jnp.float32)
        if masked:
            # Only the single global-last tile can be ragged; lanes >= rem
            # hold unspecified padding and must be zeroed before the product.
            lane = jax.lax.broadcasted_iota(jnp.int32, x.shape, dimension=1)
            valid = lane < rem
            x = jnp.where(valid, x, 0.0)
            y = jnp.where(valid, y, 0.0)
        # Per-step cross-lane reduce (XLU slot, idle otherwise) into tiny
        # (tile_r, 1) f32 accumulators -> no full-width accumulator traffic.
        acc_xy[...] += (x * y).sum(axis=1, keepdims=True)
        acc_s[...] += (x + y).sum(axis=1, keepdims=True)

    if ragged:
        is_global_last = jnp.logical_and(p == n_p - 1, j == n_j - 1)

        @pl.when(jnp.logical_not(is_global_last))
        def _steady():
            _accumulate(False)

        @pl.when(is_global_last)
        def _tail():
            _accumulate(True)
    else:
        _accumulate(False)

    @pl.when(j == n_j - 1)
    def _finalize():
        out_ref[:, 0:1] = acc_xy[...]
        out_ref[:, 1:2] = acc_s[...]


def soft_dice_loss(x, y, smooth=1.0):
    """SoftDiceLoss(smooth, dims=(-2, -1)).forward(x, y) for NCHW inputs.

    x / y may be passed as bf16 (or y as int8) to halve HBM traffic; the
    kernel up-casts to f32 internally and accumulates in f32.
    """
    B, C, H, W = x.shape
    R = B * C
    L = H * W

    # Contiguous (free) reshape; no host-side pad or dtype upcast.
    xr = x.reshape(R, L)
    yr = y.reshape(R, L)

    budget, vmem_limit = _vmem_budgets()
    tile_r = _pick_row_tile(R)
    tile_l = _pick_col_tile(tile_r, L, xr.dtype.itemsize, yr.dtype.itemsize,
                            budget)
    n_row = R // tile_r
    n_col_total = pl.cdiv(L, tile_l)

    # v7x dual-TensorCore: if the row axis yields a single parallel block,
    # split the reduction range into two equal "parallel" column chunks and
    # add the per-chunk partial sums on the host.  Only enabled when the
    # chunks are equal so no extra in-kernel bounds handling is needed.
    if n_row == 1 and n_col_total >= 2 and n_col_total % 2 == 0:
        n_split = 2
    else:
        n_split = 1
    n_col = n_col_total // n_split

    rem = L % tile_l
    ragged = rem != 0
    kernel = functools.partial(_dice_sums_kernel, rem=rem, ragged=ragged)

    out = pl.pallas_call(
        kernel,
        out_shape=jax.ShapeDtypeStruct((n_split, R, 2), jnp.float32),
        grid_spec=pltpu.PrefetchScalarGridSpec(
            num_scalar_prefetch=0,
            grid=(n_split, n_row, n_col),
            in_specs=[
                pl.BlockSpec((tile_r, tile_l),
                             lambda p, i, j: (i, p * n_col + j)),
                pl.BlockSpec((tile_r, tile_l),
                             lambda p, i, j: (i, p * n_col + j)),
            ],
            out_specs=pl.BlockSpec((None, tile_r, 2),
                                   lambda p, i, j: (p, i, 0)),
            scratch_shapes=[
                pltpu.VMEM((tile_r, 1), jnp.float32),   # acc sum(x*y)
                pltpu.VMEM((tile_r, 1), jnp.float32),   # acc sum(x+y)
            ],
        ),
        compiler_params=pltpu.CompilerParams(
            dimension_semantics=("parallel", "parallel", "arbitrary"),
            vmem_limit_bytes=vmem_limit,
        ),
    )(xr, yr)

    # Combine per-chunk partial sums, then the dice ratio:
    #   tp = sxy, fp = sx - sxy, fn = sy - sxy
    #   (2*tp + s) / (2*tp + fp + fn + s) == (2*sxy + s) / (sx + sy + s)
    sxy = out[:, :, 0].sum(axis=0)
    ssum = out[:, :, 1].sum(axis=0)
    dc = (2.0 * sxy + smooth) / (ssum + smooth)
    return 1.0 - dc.mean()


def _reference_soft_dice_loss(x, y, smooth=1.0):
    tp = (x * y).sum((-2, -1))
    fp = (x * (1.0 - y)).sum((-2, -1))
    fn = ((1.0 - x) * y).sum((-2, -1))
    dc = (2.0 * tp + smooth) / (2.0 * tp + fp + fn + smooth)
    return 1.0 - dc.mean()


if __name__ == "__main__":
    key = jax.random.PRNGKey(0)
    kx, ky = jax.random.split(key)

    B, C, H, W = 2, 4, 16, 16
    # x: soft predictions in [0, 1]; y: binary targets (callers may pass
    # bf16/int8 — the kernel up-casts internally).
    x = jax.nn.sigmoid(jax.random.normal(kx, (B, C, H, W), dtype=jnp.float32))
    y = (jax.random.uniform(ky, (B, C, H, W)) > 0.5).astype(jnp.float32)

    loss = jax.jit(soft_dice_loss)(x, y)
    loss = jax.block_until_ready(loss)

    ref = _reference_soft_dice_loss(x, y, smooth=1.0)
    assert jnp.allclose(loss, ref, rtol=1e-5, atol=1e-5), (loss, ref)

    print("KERNEL_OK")
</pallas_src>

<mosaic_0001>
module attributes {stable_mosaic.version = 11 : i64} {
  func.func @_dice_sums_kernel(%arg0: i32, %arg1: i32, %arg2: i32, %arg3: memref<8x256xf32, #tpu.memory_space<vmem>>, %arg4: memref<8x256xf32, #tpu.memory_space<vmem>>, %arg5: memref<1x8x2xf32, #tpu.memory_space<vmem>>, %arg6: memref<8x1xf32, #tpu.memory_space<vmem>>, %arg7: memref<8x1xf32, #tpu.memory_space<vmem>>) attributes {dimension_semantics = [#tpu.dimension_semantics<parallel>, #tpu.dimension_semantics<parallel>, #tpu.dimension_semantics<arbitrary>], iteration_bounds = array<i64: 1, 1, 1>, scalar_prefetch = 0 : i64, scratch_operands = 2 : i64, tpu.core_type = #tpu.core_type<tc>, window_params = [{transform_indices = @transform_0, window_bounds = array<i64: 8, 256>}, {transform_indices = @transform_1, window_bounds = array<i64: 8, 256>}, {transform_indices = @transform_2, window_bounds = array<i64: 1, 8, 2>}]} {
    %c0_i32 = arith.constant 0 : i32
    %0 = arith.cmpi eq, %arg2, %c0_i32 : i32
    %1 = arith.extui %0 : i1 to i32
    %c0_i32_0 = arith.constant 0 : i32
    %2 = arith.cmpi ne, %1, %c0_i32_0 : i32
    scf.if %2 {
      %cst_15 = arith.constant 0.000000e+00 : f32
      %20 = vector.broadcast %cst_15 : f32 to vector<8x1xf32>
      %c0_16 = arith.constant 0 : index
      %c0_17 = arith.constant 0 : index
      %21 = vector.load %arg6[%c0_16, %c0_17] : memref<8x1xf32, #tpu.memory_space<vmem>>, vector<8x1xf32>
      tpu.vector_store %arg6[%c0_16, %c0_17], %20 {strides = array<i32>} : memref<8x1xf32, #tpu.memory_space<vmem>>, vector<8x1xf32>,
      %cst_18 = arith.constant 0.000000e+00 : f32
      %22 = vector.broadcast %cst_18 : f32 to vector<8x1xf32>
      %c0_19 = arith.constant 0 : index
      %c0_20 = arith.constant 0 : index
      %23 = vector.load %arg7[%c0_19, %c0_20] : memref<8x1xf32, #tpu.memory_space<vmem>>, vector<8x1xf32>
      tpu.vector_store %arg7[%c0_19, %c0_20], %22 {strides = array<i32>} : memref<8x1xf32, #tpu.memory_space<vmem>>, vector<8x1xf32>,
    } else {
    }
    %c0 = arith.constant 0 : index
    %c0_1 = arith.constant 0 : index
    %3 = vector.load %arg3[%c0, %c0_1] : memref<8x256xf32, #tpu.memory_space<vmem>>, vector<8x256xf32>
    %c0_2 = arith.constant 0 : index
    %c0_3 = arith.constant 0 : index
    %4 = vector.load %arg4[%c0_2, %c0_3] : memref<8x256xf32, #tpu.memory_space<vmem>>, vector<8x256xf32>
    %c0_4 = arith.constant 0 : index
    %c0_5 = arith.constant 0 : index
    %5 = vector.load %arg6[%c0_4, %c0_5] : memref<8x1xf32, #tpu.memory_space<vmem>>, vector<8x1xf32>
    %6 = arith.mulf %3, %4 : vector<8x256xf32>
    %cst = arith.constant dense<0.000000e+00> : vector<8xf32>
    %7 = vector.multi_reduction <add>, %6, %cst [1] : vector<8x256xf32> to vector<8xf32>
    %8 = vector.shape_cast %7 : vector<8xf32> to vector<8x1xf32>
    %9 = arith.addf %5, %8 : vector<8x1xf32>
    %c0_6 = arith.constant 0 : index
    %c0_7 = arith.constant 0 : index
    %10 = vector.load %arg6[%c0_6, %c0_7] : memref<8x1xf32, #tpu.memory_space<vmem>>, vector<8x1xf32>
    tpu.vector_store %arg6[%c0_6, %c0_7], %9 {strides = array<i32>} : memref<8x1xf32, #tpu.memory_space<vmem>>, vector<8x1xf32>,
    %c0_8 = arith.constant 0 : index
    %c0_9 = arith.constant 0 : index
    %11 = vector.load %arg7[%c0_8, %c0_9] : memref<8x1xf32, #tpu.memory_space<vmem>>, vector<8x1xf32>
    %12 = arith.addf %3, %4 : vector<8x256xf32>
    %cst_10 = arith.constant dense<0.000000e+00> : vector<8xf32>
    %13 = vector.multi_reduction <add>, %12, %cst_10 [1] : vector<8x256xf32> to vector<8xf32>
    %14 = vector.shape_cast %13 : vector<8xf32> to vector<8x1xf32>
    %15 = arith.addf %11, %14 : vector<8x1xf32>
    %c0_11 = arith.constant 0 : index
    %c0_12 = arith.constant 0 : index
    %16 = vector.load %arg7[%c0_11, %c0_12] : memref<8x1xf32, #tpu.memory_space<vmem>>, vector<8x1xf32>
    tpu.vector_store %arg7[%c0_11, %c0_12], %15 {strides = array<i32>} : memref<8x1xf32, #tpu.memory_space<vmem>>, vector<8x1xf32>,
    %c0_i32_13 = arith.constant 0 : i32
    %17 = arith.cmpi eq, %arg2, %c0_i32_13 : i32
    %18 = arith.extui %17 : i1 to i32
    %c0_i32_14 = arith.constant 0 : i32
    %19 = arith.cmpi ne, %18, %c0_i32_14 : i32
    scf.if %19 {
      %c0_15 = arith.constant 0 : index
      %c0_16 = arith.constant 0 : index
      %20 = vector.load %arg6[%c0_15, %c0_16] : memref<8x1xf32, #tpu.memory_space<vmem>>, vector<8x1xf32>
      %c0_17 = arith.constant 0 : index
      %c0_18 = arith.constant 0 : index
      %c0_19 = arith.constant 0 : index
      %21 = vector.load %arg5[%c0_17, %c0_18, %c0_19] : memref<1x8x2xf32, #tpu.memory_space<vmem>>, vector<1x8x1xf32>
      %22 = vector.shape_cast %21 : vector<1x8x1xf32> to vector<8x1xf32>
      %23 = vector.shape_cast %20 : vector<8x1xf32> to vector<1x8x1xf32>
      tpu.vector_store %arg5[%c0_17, %c0_18, %c0_19], %23 {strides = array<i32>} : memref<1x8x2xf32, #tpu.memory_space<vmem>>, vector<1x8x1xf32>,
      %c0_20 = arith.constant 0 : index
      %c0_21 = arith.constant 0 : index
      %24 = vector.load %arg7[%c0_20, %c0_21] : memref<8x1xf32, #tpu.memory_space<vmem>>, vector<8x1xf32>
      %c0_22 = arith.constant 0 : index
      %c0_23 = arith.constant 0 : index
      %c1 = arith.constant 1 : index
      %25 = vector.load %arg5[%c0_22, %c0_23, %c1] : memref<1x8x2xf32, #tpu.memory_space<vmem>>, vector<1x8x1xf32>
      %26 = vector.shape_cast %25 : vector<1x8x1xf32> to vector<8x1xf32>
      %27 = vector.shape_cast %24 : vector<8x1xf32> to vector<1x8x1xf32>
      tpu.vector_store %arg5[%c0_22, %c0_23, %c1], %27 {strides = array<i32>} : memref<1x8x2xf32, #tpu.memory_space<vmem>>, vector<1x8x1xf32>,
    } else {
    }
    return
  }
  func.func @transform_0(%arg0: i32, %arg1: i32, %arg2: i32) -> (i32, i32) {
    %c1_i32 = arith.constant 1 : i32
    %0 = arith.muli %arg0, %c1_i32 : i32
    %1 = arith.addi %0, %arg2 : i32
    %c0_i32 = arith.constant 0 : i32
    return %arg1, %1 : i32, i32
  }
  func.func @transform_1(%arg0: i32, %arg1: i32, %arg2: i32) -> (i32, i32) {
    %c1_i32 = arith.constant 1 : i32
    %0 = arith.muli %arg0, %c1_i32 : i32
    %1 = arith.addi %0, %arg2 : i32
    %c0_i32 = arith.constant 0 : i32
    return %arg1, %1 : i32, i32
  }
  func.func @transform_2(%arg0: i32, %arg1: i32, %arg2: i32) -> (i32, i32, i32) {
    %c0_i32 = arith.constant 0 : i32
    %c0_i32_0 = arith.constant 0 : i32
    return %arg0, %arg1, %c0_i32 : i32, i32, i32
  }
}

</mosaic_0001>

<bundles_post_ra>
// kernel: soft_dice_loss.1
= control target key start
LH: loop header
LB: loop body
LE: loop exit
PB: predicated region body
PF: predicated region fallthrough
CT: control target
= control target key end

     0   :  { %vm59_vm0 = vcmask 7168   ;;  %v113_v3 = vmov 0.0   ;;  %vm93_vm1 = vcmask 15368   ;;  %s153_s0 = inlined_call_operand.vmem [shape: f32[8,256], index: 0, kind: input, shape index: {}]   ;;  %s154_s1 = inlined_call_operand.vmem [shape: f32[8,256], index: 1, kind: input, shape index: {}]   ;;  %s155_s2 = inlined_call_operand.vmem [shape: f32[1,8,2], index: 2, kind: output, shape index: {}]  }
   0x1   :  { %v62_v0 = vld [vmem:[%s153_s0] sm:$0xff]  ;;  %v63_v1 = vld [vmem:[%s153_s0 + $0x8] sm:$0xff]  ;;  %61 = vst.msk [vmem:[#allocation3] sm:$0xff] %vm59_vm0, %v113_v3  ;;  %s114_s0 = smov 1  }
   0x2   :  { %v64_v2 = vld [vmem:[%s154_s1] sm:$0xff]  ;;  %v65_v4 = vld [vmem:[%s154_s1 + $0x8] sm:$0xff]  ;;  %60 = vst.msk [vmem:[#allocation2] sm:$0xff] %vm59_vm0, %v113_v3 }
   0x3   :  { %v76_v5 = vadd.f32 %v64_v2, %v62_v0  ;;  %v77_v6 = vadd.f32 %v65_v4, %v63_v1  ;;  %v67_v8 = vmul.f32 %v64_v2, %v62_v0  ;;  %v68_v9 = vmul.f32 %v65_v4, %v63_v1 }
   0x5   :  { %v78_v7 = vadd.f32 %v77_v6, %v76_v5  ;;  %v69_v10 = vadd.f32 %v68_v9, %v67_v8 }
   0x7   :  { %79 = vadd.xlane.f32.xlu0 %v78_v7 }
   0x8   :  { %v75_v11 = vld [vmem:[#allocation3] sm:$0xff] }
   0x9   :  { %v66_v14 = vld [vmem:[#allocation2] sm:$0xff] }
   0xf   :  { %70 = vadd.xlane.f32.xlu0 %v69_v10 }
  0x7a   :  { %v80_v12 = vpop.xlane.xlu0 %79 }
  0x7b   :  { %v81_v13 = vadd.f32 %v80_v12, %v75_v11 }
  0x7d   :  { %82 = vst.msk [vmem:[#allocation3] sm:$0xff] %vm59_vm0, %v81_v13 }
  0x82   :  { %v71_v15 = vpop.xlane.xlu0 %70 }
  0x83   :  { %v72_v16 = vadd.f32 %v71_v15, %v66_v14 }
  0x84   :  { %v88_v17 = vld [vmem:[#allocation3] sm:$0xff] }
  0x85   :  { %90 = vrot.lane.b32.xlu1 %v88_v17, %s114_s0  ;;  %74 = vst.msk [vmem:[#allocation2] sm:$0xff] %vm59_vm0, %v72_v16 }
  0x8c   :  { %v86_v18 = vld [vmem:[#allocation2] sm:$0xff] }
  0x8d   :  { %87 = vst.msk [vmem:[%s155_s2] sm:$0xff] %vm59_vm0, %v86_v18 }
  0xf7   :  { %v91_v19 = vpop.permute.xlu1 %90 }
  0xf8   :  { %94 = vst.msk [vmem:[%s155_s2] sm:$0xff] %vm93_vm1, %v91_v19 }

</bundles_post_ra>
